<compile_context>
chip_gen: v7x
topology: tpu7x:2x2x1
jax: 0.10.0
libtpu: 0.0.40
codegen_flags: <defaults>
</compile_context>

<pallas_src>
import functools

import jax
import jax.numpy as jnp
from jax.experimental import pallas as pl
from jax.experimental.pallas import tpu as pltpu


def _se_kernel(x_ref, w1t_ref, b1_ref, w2t_ref, b2_ref, o_ref, *, inv_hw):
    # x_ref : (nb, C, HWp)   w1t_ref: (C, mid)   b1_ref: (1, mid)
    # w2t_ref: (mid, C)      b2_ref : (1, C)     o_ref : (nb, C, HWp)
    x = x_ref[...]

    # --- squeeze: global average pool over the (padded) spatial dim.
    #     Padding lanes are zero, so the sum is exact; divide by the true HW.
    s = jnp.sum(x.astype(jnp.float32), axis=-1) * inv_hw                     # (nb, C)

    # --- excitation: two tiny f32 dots (the 1x1 convs) ---
    h = jnp.dot(s, w1t_ref[...], preferred_element_type=jnp.float32) + b1_ref[...]
    h = jnp.maximum(h, 0.0)                                                  # (nb, mid)
    z = jnp.dot(h, w2t_ref[...], preferred_element_type=jnp.float32) + b2_ref[...]
    gate = jax.nn.sigmoid(z)                                                 # (nb, C)

    # --- scale: broadcast multiply over the spatial (lane) dim ---
    o_ref[...] = x * gate.astype(x.dtype)[:, :, None]


def _pick_block_batch(n, per_sample_bytes, max_block_bytes):
    """Largest divisor of n whose x-block stays under budget; keep >= 2 grid steps."""
    cap = max(1, max_block_bytes // max(per_sample_bytes, 1))
    if n >= 2:
        cap = min(cap, -(-n // 2))  # grid >= 2 steps -> both v7x TensorCores busy
    nb = 1
    for d in range(1, n + 1):
        if n % d == 0 and d <= cap:
            nb = d
    return nb


def squeeze_and_excitation(x, w1, b1, w2, b2):
    """SE forward.

    x : (N, C, H, W) float32 or bfloat16.
    w1: (mid, C), b1: (mid, 1) or (mid,)   -- Conv2d(C, mid, 1) params.
    w2: (C, mid), b2: (C, 1)  or (C,)      -- Conv2d(mid, C, 1) params.
    """
    N, C, H, W = x.shape
    mid = w1.shape[0]
    HW = H * W
    HWp = -(-HW // 128) * 128                       # lane-dense last dim
    itemsize = jnp.dtype(x.dtype).itemsize

    x2 = x.reshape(N, C, HW)
    if HWp != HW:
        x2 = jnp.pad(x2, ((0, 0), (0, 0), (0, HWp - HW)))

    # Weights pre-transposed / biases as rows so the kernel is two plain dots.
    w1t = jnp.transpose(w1).astype(jnp.float32)     # (C, mid)
    w2t = jnp.transpose(w2).astype(jnp.float32)     # (mid, C)
    b1r = jnp.reshape(b1, (1, mid)).astype(jnp.float32)
    b2r = jnp.reshape(b2, (1, C)).astype(jnp.float32)

    # --- block sizing: a few MiB per x block; budget stays under v7x's 64 MiB ---
    per_sample = C * HWp * itemsize
    max_block_bytes = 8 * 1024 * 1024
    nb = _pick_block_batch(N, per_sample, max_block_bytes)
    # TODO(synk): if a single sample (nb=1) still exceeds the block budget
    # (very large C*H*W), restructure as a two-pass HW-tiled reduce+scale pipeline.

    block_bytes = nb * per_sample
    weight_bytes = int(w1t.size + w2t.size + b1r.size + b2r.size) * 4
    vmem_need = 4 * block_bytes + 2 * weight_bytes + (2 << 20)  # double-buffered in+out
    vmem_limit = int(min(max(vmem_need, 32 << 20), 48 << 20))

    kernel = functools.partial(_se_kernel, inv_hw=float(1.0 / HW))

    out = pl.pallas_call(
        kernel,
        out_shape=jax.ShapeDtypeStruct((N, C, HWp), x.dtype),
        grid_spec=pltpu.PrefetchScalarGridSpec(
            num_scalar_prefetch=0,
            grid=(N // nb,),
            in_specs=[
                pl.BlockSpec((nb, C, HWp), lambda n: (n, 0, 0)),
                pl.BlockSpec((C, mid), lambda n: (0, 0)),
                pl.BlockSpec((1, mid), lambda n: (0, 0)),
                pl.BlockSpec((mid, C), lambda n: (0, 0)),
                pl.BlockSpec((1, C), lambda n: (0, 0)),
            ],
            out_specs=pl.BlockSpec((nb, C, HWp), lambda n: (n, 0, 0)),
        ),
        compiler_params=pltpu.CompilerParams(
            dimension_semantics=("parallel",),
            vmem_limit_bytes=vmem_limit,
        ),
    )(x2, w1t, b1r, w2t, b2r)

    if HWp != HW:
        out = out[:, :, :HW]
    return out.reshape(N, C, H, W)


def se_reference(x, w1, b1, w2, b2):
    """Pure-JAX reference mirroring the PyTorch forward."""
    xf = x.astype(jnp.float32)
    s = jnp.mean(xf, axis=(2, 3), keepdims=True)                              # (N, C, 1, 1)
    h = jnp.einsum("mc,nchw->nmhw", w1.astype(jnp.float32), s)
    h = h + jnp.reshape(b1, (1, -1, 1, 1)).astype(jnp.float32)
    h = jnp.maximum(h, 0.0)
    z = jnp.einsum("cm,nmhw->nchw", w2.astype(jnp.float32), h)
    z = z + jnp.reshape(b2, (1, -1, 1, 1)).astype(jnp.float32)
    return (xf * jax.nn.sigmoid(z)).astype(x.dtype)


if __name__ == "__main__":
    # channel=32, reduction=16 -> mid=2 (mirrors nn.Conv2d(32, 2, 1) / nn.Conv2d(2, 32, 1))
    N, C, H, W = 2, 32, 16, 16
    reduction = 16
    mid = C // reduction

    key = jax.random.PRNGKey(0)
    kx, k1, k2, k3, k4 = jax.random.split(key, 5)

    x = jax.random.normal(kx, (N, C, H, W), dtype=jnp.float32)
    # Conv2d(C, mid, 1) weight (mid, C, 1, 1) -> (mid, C); bias (mid,) -> (mid, 1)
    w1 = jax.random.normal(k1, (mid, C), dtype=jnp.float32) * 0.2
    b1 = jax.random.normal(k2, (mid, 1), dtype=jnp.float32) * 0.1
    # Conv2d(mid, C, 1) weight (C, mid, 1, 1) -> (C, mid); bias (C,) -> (C, 1)
    w2 = jax.random.normal(k3, (C, mid), dtype=jnp.float32) * 0.2
    b2 = jax.random.normal(k4, (C, 1), dtype=jnp.float32) * 0.1

    # f32 path
    y = jax.block_until_ready(squeeze_and_excitation(x, w1, b1, w2, b2))
    y_ref = se_reference(x, w1, b1, w2, b2)
    assert y.shape == (N, C, H, W)
    assert jnp.allclose(y, y_ref, atol=1e-5, rtol=1e-5)

    # bf16 I/O path (halves HBM traffic; gate still computed in f32 in-kernel).
    xb = x.astype(jnp.bfloat16)
    yb = jax.block_until_ready(squeeze_and_excitation(xb, w1, b1, w2, b2))
    yb_ref = se_reference(xb.astype(jnp.float32), w1, b1, w2, b2)
    assert yb.dtype == jnp.bfloat16
    assert jnp.allclose(yb.astype(jnp.float32), yb_ref, atol=5e-2, rtol=5e-2)

    print("KERNEL_OK")
</pallas_src>

<mosaic_0001>
module attributes {stable_mosaic.version = 11 : i64} {
  func.func @_se_kernel(%arg0: i32, %arg1: memref<1x32x256xf32, #tpu.memory_space<vmem>>, %arg2: memref<32x2xf32, #tpu.memory_space<vmem>>, %arg3: memref<1x2xf32, #tpu.memory_space<vmem>>, %arg4: memref<2x32xf32, #tpu.memory_space<vmem>>, %arg5: memref<1x32xf32, #tpu.memory_space<vmem>>, %arg6: memref<1x32x256xf32, #tpu.memory_space<vmem>>) attributes {dimension_semantics = [#tpu.dimension_semantics<parallel>], iteration_bounds = array<i64: 2>, scalar_prefetch = 0 : i64, scratch_operands = 0 : i64, tpu.core_type = #tpu.core_type<tc>, window_params = [{transform_indices = @transform_0, window_bounds = array<i64: 1, 32, 256>}, {pipeline_mode = #tpu.pipeline_mode<synchronous>, transform_indices = @transform_1, window_bounds = array<i64: 32, 2>}, {pipeline_mode = #tpu.pipeline_mode<synchronous>, transform_indices = @transform_2, window_bounds = array<i64: 1, 2>}, {pipeline_mode = #tpu.pipeline_mode<synchronous>, transform_indices = @transform_3, window_bounds = array<i64: 2, 32>}, {pipeline_mode = #tpu.pipeline_mode<synchronous>, transform_indices = @transform_4, window_bounds = array<i64: 1, 32>}, {transform_indices = @transform_5, window_bounds = array<i64: 1, 32, 256>}]} {
    %c0 = arith.constant 0 : index
    %c0_0 = arith.constant 0 : index
    %c0_1 = arith.constant 0 : index
    %0 = vector.load %arg1[%c0, %c0_0, %c0_1] : memref<1x32x256xf32, #tpu.memory_space<vmem>>, vector<1x32x256xf32>
    %cst = arith.constant dense<0.000000e+00> : vector<1x32xf32>
    %1 = vector.multi_reduction <add>, %0, %cst [2] : vector<1x32x256xf32> to vector<1x32xf32>
    %cst_2 = arith.constant 3.906250e-03 : f32
    %2 = vector.broadcast %cst_2 : f32 to vector<1x32xf32>
    %3 = arith.mulf %1, %2 : vector<1x32xf32>
    %c0_3 = arith.constant 0 : index
    %c0_4 = arith.constant 0 : index
    %4 = vector.load %arg2[%c0_3, %c0_4] : memref<32x2xf32, #tpu.memory_space<vmem>>, vector<32x2xf32>
    %cst_5 = arith.constant dense<0.000000e+00> : vector<1x2xf32>
    %5 = tpu.matmul %3, %4, %cst_5 {dimension_numbers = #tpu.dot_dimension_numbers<[1], [0], [0], [1], [0, 0, 1, 1], [], []>} : vector<1x32xf32>, vector<32x2xf32>, vector<1x2xf32> -> vector<1x2xf32>
    %c0_6 = arith.constant 0 : index
    %c0_7 = arith.constant 0 : index
    %6 = vector.load %arg3[%c0_6, %c0_7] : memref<1x2xf32, #tpu.memory_space<vmem>>, vector<1x2xf32>
    %7 = arith.addf %5, %6 : vector<1x2xf32>
    %cst_8 = arith.constant 0.000000e+00 : f32
    %8 = vector.broadcast %cst_8 : f32 to vector<1x2xf32>
    %9 = arith.maximumf %7, %8 : vector<1x2xf32>
    %c0_9 = arith.constant 0 : index
    %c0_10 = arith.constant 0 : index
    %10 = vector.load %arg4[%c0_9, %c0_10] : memref<2x32xf32, #tpu.memory_space<vmem>>, vector<2x32xf32>
    %cst_11 = arith.constant dense<0.000000e+00> : vector<1x32xf32>
    %11 = tpu.matmul %9, %10, %cst_11 {dimension_numbers = #tpu.dot_dimension_numbers<[1], [0], [0], [1], [0, 0, 1, 1], [], []>} : vector<1x2xf32>, vector<2x32xf32>, vector<1x32xf32> -> vector<1x32xf32>
    %c0_12 = arith.constant 0 : index
    %c0_13 = arith.constant 0 : index
    %12 = vector.load %arg5[%c0_12, %c0_13] : memref<1x32xf32, #tpu.memory_space<vmem>>, vector<1x32xf32>
    %13 = arith.addf %11, %12 : vector<1x32xf32>
    %14 = arith.negf %13 : vector<1x32xf32>
    %15 = math.exp %14 : vector<1x32xf32>
    %cst_14 = arith.constant 1.000000e+00 : f32
    %16 = vector.broadcast %cst_14 : f32 to vector<1x32xf32>
    %17 = arith.addf %16, %15 : vector<1x32xf32>
    %18 = arith.divf %16, %17 : vector<1x32xf32>
    %19 = vector.shape_cast %18 : vector<1x32xf32> to vector<1x32x1xf32>
    %20 = vector.broadcast %19 : vector<1x32x1xf32> to vector<1x32x256xf32>
    %21 = arith.mulf %0, %20 : vector<1x32x256xf32>
    %c0_15 = arith.constant 0 : index
    %c0_16 = arith.constant 0 : index
    %c0_17 = arith.constant 0 : index
    %22 = vector.load %arg6[%c0_15, %c0_16, %c0_17] : memref<1x32x256xf32, #tpu.memory_space<vmem>>, vector<1x32x256xf32>
    tpu.vector_store %arg6[%c0_15, %c0_16, %c0_17], %21 {strides = array<i32>} : memref<1x32x256xf32, #tpu.memory_space<vmem>>, vector<1x32x256xf32>,
    return
  }
  func.func @transform_0(%arg0: i32) -> (i32, i32, i32) {
    %c0_i32 = arith.constant 0 : i32
    %c0_i32_0 = arith.constant 0 : i32
    %c0_i32_1 = arith.constant 0 : i32
    return %arg0, %c0_i32, %c0_i32_0 : i32, i32, i32
  }
  func.func @transform_1(%arg0: i32) -> (i32, i32) {
    %c0_i32 = arith.constant 0 : i32
    %c0_i32_0 = arith.constant 0 : i32
    %c0_i32_1 = arith.constant 0 : i32
    return %c0_i32, %c0_i32_0 : i32, i32
  }
  func.func @transform_2(%arg0: i32) -> (i32, i32) {
    %c0_i32 = arith.constant 0 : i32
    %c0_i32_0 = arith.constant 0 : i32
    %c0_i32_1 = arith.constant 0 : i32
    return %c0_i32, %c0_i32_0 : i32, i32
  }
  func.func @transform_3(%arg0: i32) -> (i32, i32) {
    %c0_i32 = arith.constant 0 : i32
    %c0_i32_0 = arith.constant 0 : i32
    %c0_i32_1 = arith.constant 0 : i32
    return %c0_i32, %c0_i32_0 : i32, i32
  }
  func.func @transform_4(%arg0: i32) -> (i32, i32) {
    %c0_i32 = arith.constant 0 : i32
    %c0_i32_0 = arith.constant 0 : i32
    %c0_i32_1 = arith.constant 0 : i32
    return %c0_i32, %c0_i32_0 : i32, i32
  }
  func.func @transform_5(%arg0: i32) -> (i32, i32, i32) {
    %c0_i32 = arith.constant 0 : i32
    %c0_i32_0 = arith.constant 0 : i32
    %c0_i32_1 = arith.constant 0 : i32
    return %arg0, %c0_i32, %c0_i32_0 : i32, i32, i32
  }
}

</mosaic_0001>

<bundles_post_ra>
// kernel: tpu_custom_call.1
= control target key start
LH: loop header
LB: loop body
LE: loop exit
PB: predicated region body
PF: predicated region fallthrough
CT: control target
= control target key end

     0   :  { %10 = vsyncpa [#allocation3], 0  ;;  %s1047_s0 = inlined_call_operand.hbm [shape: f32[2,32,256], index: 0, kind: input, shape index: {}]   ;;  %s1048_s1 = inlined_call_operand.vmem [shape: f32[32,2], index: 1, kind: input, shape index: {}]   ;;  %s1049_s2 = inlined_call_operand.vmem [shape: f32[1,2], index: 2, kind: input, shape index: {}]   ;;  %s1050_s3 = inlined_call_operand.vmem [shape: f32[2,32], index: 3, kind: input, shape index: {}]   ;;  %s1051_s4 = inlined_call_operand.vmem [shape: f32[1,32], index: 4, kind: input, shape index: {}]   ;;  %s1052_s5 = inlined_call_operand.hbm [shape: f32[2,32,256], index: 5, kind: output, shape index: {}]  }
   0x1   :  { %12 = vsyncpa [#allocation3 + $0x1], 0 }
   0x2   :  { %13 = vsyncpa [#allocation4], 0 }
   0x3   :  { %15 = vsyncpa [#allocation4 + $0x1], 0  ;;  %s828_s18 = smov 0   ;;  %s830_s19 = smov 0  }
   0x4   :  { %s832_s20 = smov 0   ;;  %s834_s21 = smov 0  }
   0x5 LB: > { %s849_s22 = sadd.s32 4294967295, %s787_s21   ;;  %s585_s23 = sadd.s32 4294967294, %s787_s21   ;;  %s787_s21 = sphi %s834_s21, %s1065_s21   ;;  %s783_s20 = sphi %s832_s20, %s1064_s20   ;;  %s779_s19 = sphi %s830_s19, %s1063_s19   ;;  %s775_s18 = sphi %s828_s18, %s1062_s18  }
   0x6   : > { %s853_s24 = sadd.s32 1, %s787_s21   ;;  %s28_s25 = sadd.s32 1, %s783_s20 }
   0x7   : > { %s25_s26 = ssub.s32 %s787_s21, %s853_s24  ;;  %p35_p0 = scmp.ne.s32.totalorder %s783_s20, %s779_s19 }
   0x8   : > { %p26_p1 = scmp.eq.s32.totalorder %s25_s26, 0  ;;  %p36_p2 = scmp.eq.s32.totalorder %s787_s21, 0 }
   0x9   : > { %p41_p3 = scmp.ne.s32.totalorder %s779_s19, %s775_s18  ;;  %p42_p4 = scmp.eq.s32.totalorder %s849_s22, 0 }
   0xa   : > { %s865_s27 = scalar_select %p26_p1, %s783_s20, %s28_s25  }
   0xb   : > { %p867_p5 = por %p36_p2, %p35_p0  ;;  %p871_p6 = por %p42_p4, %p41_p3 }
   0xc   : > { %p149_p7 = scmp.eq.s32.totalorder %s849_s22, 1  ;;  %p155_p8 = scmp.eq.s32.totalorder %s585_s23, 1 }
   0xd   : > { %p646_p10 = scmp.lt.s32.totalorder %s787_s21, 2  ;;  %s187_s7 = sand.u32 1, %s783_s20  }
   0xe   : > { %p878_p11 = por %p149_p7, %p35_p0  ;;  %p882_p12 = por %p155_p8, %p41_p3 }
   0xf   : > { %s603_s8 = sshll.u32 %s787_s21, 10  ;;  %s588_s9 = sshll.u32 %s187_s7, 6 }
  0x10   : > { %s1056_s30 = scalar_select %p878_p11, 1, 0 }
  0x11   : > { %s1057_s6 = scalar_select %p882_p12, 1, 0 }
  0x12   : > { %s891_s12 = scalar_lea.hbm %s1047_s0, %s603_s8  ;;  %s191_s13 = scalar_lea.vmem [#allocation2], %s588_s9 }
  0x13   : > { %s198_s14 = sshll.u32 %s191_s13, 4  ;;  %p895_p13 = pnand %p646_p10, %p867_p5  ;;  %s899_s14 = int_to_ptr.vmem [resolvable:$true] %s198_s14 }
  0x14   : > { %s901_s16 = scalar_lea.sflag [#allocation3], %s187_s7  ;;  %s691_s17 = scalar_lea.hbm %s891_s12, 1024 }
  0x15   : > { %p692_p0 = scmp.ne.s32.totalorder %s891_s12, %s691_s17  ;;  %p693_p1 = pneg %p895_p13 }
  0x16   : > { %s696_s26 = scalar_lea.hbm %s1047_s0, 2048  ;;  %p697_p4 = scmp.lt.u32.totalorder %s891_s12, %s1047_s0 }
  0x17   : > { %p694_p2 = pnand %p693_p1, %p692_p0  ;;  %p698_p5 = scmp.lt.u32.totalorder %s696_s26, %s691_s17 }
  0x18   : > { %p700_p8 = scmp.lt.u32.totalorder %s691_s17, %s891_s12 }
  0x19   : > { %p695_p3 = pneg %p694_p2  ;;  %p699_p7 = por %p698_p5, %p697_p4 }
  0x1b   : > { %p701_p10 = por %p700_p8, %p699_p7 }
  0x1d   : > { %p702_p9 = pnand %p701_p10, %p695_p3 }
  0x1f   : > { %705 = shalt.err (!%p702_p9)
}
  0x20   : > { %s706_s7 = scalar_lea.vmem %s899_s14, 1024  ;;  %s789_s9 = smov [#allocation2]  }
  0x21   : > { %p707_p0 = scmp.ne.s32.totalorder %s899_s14, %s706_s7  ;;  %s711_s10 = sshll.u32 %s789_s9, 4  ;;  %s712_s10 = int_to_ptr.vmem [resolvable:$false] %s711_s10 }
  0x22   : > { %s713_s11 = scalar_lea.vmem %s712_s10, 2048  ;;  %p714_p11 = scmp.lt.s32.totalorder %s899_s14, %s712_s10 }
  0x23   : > { %p709_p2 = pnand %p707_p0, %p693_p1  ;;  %p715_p4 = scmp.lt.s32.totalorder %s713_s11, %s706_s7 }
  0x25   : > { %p710_p12 = pneg %p709_p2  ;;  %p716_p5 = por %p715_p4, %p714_p11 }
  0x27   : > { %p717_p7 = pnand %p716_p5, %p710_p12 }
  0x29   : > { %720 = shalt.err (!%p717_p7)
}
  0x2a   : > { %s790_s13 = smov 256   ;;  %s791_s17 = smov 16  }
  0x2b   : > { %641 = dma.hbm_to_vmem [thread:$0]  (!%p895_p13), %s891_s12, 1024, %s899_s14, %s901_s16, %s790_s13, %s790_s13, %s791_s17  }
  0x2c   : > { %p591_p9 = scmp.ge.s32.totalorder %s787_s21, 1  ;;  %p206_p1 = scmp.lt.s32.totalorder %s787_s21, 3 }
  0x2e   : > { %p207_p3 = pnand %p591_p9, %p206_p1 }
  0x2f   : > { %s932_s23 = sand.u32 (!%p207_p3), 1, %s779_s19  }
  0x30   : > { %210 = sbr.rel (%p207_p3) target bundleno = 810 (0x32a), region = 40  ;;  %s592_s25 = sshll.u32 (!%p207_p3), %s932_s23, 6 }
  0x31   : > { %s213_s26 = scalar_lea.sflag (!%p207_p3), [#allocation3], %s932_s23  ;;  %s216_s28 = scalar_lea.vmem (!%p207_p3), [#allocation2], %s592_s25 }
  0x37   : > { %766 = dma.done.wait (%p871_p6), %s213_s26, 1024  }
  0x38   : > { %768 = vsyncadd (%p871_p6), %s213_s26, 4294966272  ;;  %v942_v0 = vld [vmem:[%s216_s28] sm:$0xff]  ;;  %v944_v1 = vld [vmem:[%s216_s28 + $0x8] sm:$0xff]  ;;  %v792_v15 = vmov 0.0|0.0   ;;  %vm793_vm0 = vmmov 0   ;;  %v794_v19 = vmov 0.0   ;;  %v276_v20 = vlaneseq }
  0x39   : > { %v946_v2 = vld [vmem:[%s216_s28 + $0x20] sm:$0xff]  ;;  %v251_v3 = vadd.f32 %v944_v1, %v942_v0  ;;  %v950_v4 = vld [vmem:[%s216_s28 + $0x28] sm:$0xff]  ;;  %v952_v5 = vld [vmem:[%s216_s28 + $0x10] sm:$0xff]  ;;  %628 = vmatprep.subr.bf16.mxu0 %v792_v15  ;;  %620 = vmatprep.mubr.msk.f32.mxu0 %vm793_vm0, %v794_v19  ;;  %vm287_vm1 = vcmask 130112   ;;  %vm294_vm2 = vcmask 195712   ;;  %vm301_vm3 = vcmask 261312  }
  0x3a   : > { %v954_v6 = vld [vmem:[%s216_s28 + $0x18] sm:$0xff]  ;;  %v257_v7 = vadd.f32 %v950_v4, %v946_v2  ;;  %v958_v8 = vld [vmem:[%s216_s28 + $0x30] sm:$0xff]  ;;  %v267_v12 = vld [vmem:[%s1048_s1] sm:$0xff]  ;;  %623 = vmatprep.subr.mxu1 %v794_v19  ;;  %625 = vmatprep.mubr.msk.f32.mxu1 %vm793_vm0, %v794_v19  ;;  %v277_v21 = vand.u32 127, %v276_v20  ;;  %v279_v22 = vshrl.u32 %v276_v20, 7  ;;  %vm303_vm4 = vcmask 261120  }
  0x3b   : > { %v960_v9 = vld [vmem:[%s216_s28 + $0x38] sm:$0xff]  ;;  %252 = vadd.xlane.f32.xlu0 %v251_v3  ;;  %v254_v10 = vadd.f32 %v954_v6, %v952_v5  ;;  %v268_v13 = vld [vmem:[%s1048_s1 + $0x8] sm:$0xff]  ;;  %v269_v16 = vld [vmem:[%s1048_s1 + $0x10] sm:$0xff]  ;;  %vm383_vm5 = vcmask 1041408   ;;  %vm379_vm6 = vcmask 15360   ;;  %s242_s29 = scalar_lea.vmem [#allocation5], %s592_s25 }
  0x3c   : > { %258 = vadd.xlane.f32.xlu1 %v257_v7  ;;  %v260_v11 = vadd.f32 %v960_v9, %v958_v8  ;;  %v629_v14 = vpack.c.bf16 %v268_v13, %v267_v12  ;;  %v270_v17 = vld [vmem:[%s1048_s1 + $0x18] sm:$0xff]  ;;  %v282_v23 = vadd.s32 4294967288, %v277_v21  ;;  %v289_v25 = vadd.s32 4294967280, %v277_v21  ;;  %v377_v45 = vld [vmem:[%s1050_s3] sm:$0x3]  ;;  %s512_s12 = sshll.u32 %s242_s29, 4  ;;  %s996_s12 = int_to_ptr.vmem [resolvable:$true] %s512_s12 }
  0x3d   : > { %v632_v18 = vpack.c.bf16 %v270_v17, %v269_v16  ;;  %v296_v26 = vadd.s32 4294967272, %v277_v21  ;;  %v280_v28 = vsub.s32 %v277_v21, %v279_v22  ;;  %624 = vmatpush3.msk.msra.mxu1 %vm383_vm5, %v377_v45  ;;  %v271_v46 = vld [vmem:[%s1049_s2] sm:$0x1]  ;;  %v465_v58 = vsub.s32 0, %v279_v22  ;;  %s604_s14 = sshll.u32 %s849_s22, 10  ;;  %s499_s22 = scalar_lea.sflag [#allocation4], %s932_s23 }
  0x3e   : > { %630 = vmatpush3.bf16.msra.mxu0 %v629_v14  ;;  %v285_v30 = vsub.s32 %v282_v23, %v279_v22  ;;  %v292_v31 = vsub.s32 %v289_v25, %v279_v22  ;;  %v378_v51 = vld [vmem:[%s1051_s4] sm:$0x1]  ;;  %s1001_s16 = scalar_lea.hbm %s1052_s5, %s604_s14  ;;  %s721_s8 = scalar_lea.vmem %s996_s12, 1024 }
  0x3f   : > { %255 = vadd.xlane.f32.xlu0 %v254_v10  ;;  %631 = vmatprep.subr.bf16.mxu0 %v792_v15  ;;  %v299_v34 = vsub.s32 %v296_v26, %v279_v22  ;;  %p722_p6 = scmp.ne.s32.totalorder %s996_s12, %s721_s8  ;;  %p1059_p11 = scmp.ne.s32.totalorder %s1056_s30, 0 }
  0x40   : > { %261 = vadd.xlane.f32.xlu1 %v260_v11  ;;  %s795_s7 = smov [#allocation5]  }
  0x41   : > { %p723_p12 = pnand %p722_p6, %p1059_p11  ;;  %s725_s9 = sshll.u32 %s795_s7, 4  ;;  %s726_s9 = int_to_ptr.vmem [resolvable:$false] %s725_s9 }
  0x42   : > { %633 = vmatpush3.bf16.msra.mxu0 %v632_v18  ;;  %s727_s10 = scalar_lea.vmem %s726_s9, 2048  ;;  %p728_p8 = scmp.lt.s32.totalorder %s996_s12, %s726_s9 }
  0x43   : > { %p724_p13 = pneg %p723_p12  ;;  %p729_p10 = scmp.lt.s32.totalorder %s727_s10, %s721_s8 }
  0x45   : > { %p730_p0 = por %p729_p10, %p728_p8 }
  0x47   : > { %p731_p2 = pnand %p730_p0, %p724_p13 }
  0xc8   : > { %v253_v24 = vpop.xlane.xlu0 %252 }
  0xc9   : > { %v259_v27 = vpop.xlane.xlu1 %258  ;;  %v263_v29 = vmul.f32 0.00390625, %v253_v24 }
  0xca   : > { %v265_v32 = vmul.f32 0.00390625, %v259_v27 }
  0xcb   : > { %v281_v38 = vrot.slane %v263_v29, %v280_v28 }
  0xcc   : > { %v256_v33 = vpop.xlane.xlu0 %255  ;;  %v293_v40 = vrot.slane %v265_v32, %v292_v31 }
  0xcd   : > { %v264_v35 = vmul.f32 0.00390625, %v256_v33  ;;  %v262_v36 = vpop.xlane.xlu1 %261 }
  0xce   : > { %v266_v37 = vmul.f32 0.00390625, %v262_v36 }
  0xcf   : > { %v286_v39 = vrot.slane %v264_v35, %v285_v30 }
  0xd0   : > { %v300_v41 = vrot.slane %v266_v37, %v299_v34 }
  0xd1   : > { %v288_v42 = vsel %vm287_vm1, %v286_v39, %v281_v38 }
  0xd2   : > { %v295_v43 = vsel %vm294_vm2, %v293_v40, %v288_v42 }
  0xd3   : > { %v302_v44 = vsel %vm301_vm3, %v300_v41, %v295_v43 }
  0xd4   : > { %621 = vmatmul.mubr.msk.f32.vlgmr.msra.gmra.mrb[0].mxu0 %vm303_vm4, %v302_v44 }
 0x1a7   : > { %v372_v47 = vpop.f32.mrb[0].mxu0 }
 0x1a8   : > { %v373_v48 = vadd.f32 %v372_v47, %v271_v46  ;;  %v622_v49 = vpop.f32.mrb[1].mxu0 }
 0x1aa   : > { %v376_v50 = vmax.f32 %v373_v48, 0.0 }
 0x1ac   : > { %626 = vmatmul.mubr.msk.f32.vlgmr.msra.gmra.mrb[0].mxu1 %vm379_vm6, %v376_v50 }
 0x27f   : > { %v453_v52 = vpop.f32.mrb[0].mxu1 }
 0x280   : > { %v454_v53 = vadd.f32 %v453_v52, %v378_v51  ;;  %v627_v54 = vpop.f32.mrb[1].mxu1 }
 0x282   : > { %v597_v55 = vmul.f32 -1.442695, %v454_v53 }
 0x284   : > { %687 = vpow2.f32 %v597_v55 }
 0x28e   : > { %v688_v56 = vpop.eup %687 }
 0x28f   : > { %v460_v57 = vadd.f32 1.0, %v688_v56 }
 0x291   : > { %689 = vrcp.f32 %v460_v57 }
 0x29b   : > { %v690_v59 = vpop.eup %689 }
 0x29c   : > { %v466_v60 = vrot.slane %v690_v59, %v465_v58 }
 0x29e   : > { %472 = vbcast.lane.b32.xlu1 %v466_v60, 264  ;;  %468 = vbcast.lane.b32.xlu0 %v466_v60, 256 }
 0x2a2   : > { %476 = vbcast.lane.b32.xlu1 %v466_v60, 272 }
 0x2a6   : > { %480 = vbcast.lane.b32.xlu1 %v466_v60, 280 }
 0x310   : > { %v473_v61 = vpop.permute.xlu1 %472  ;;  %v469_v62 = vpop.permute.xlu0 %468 }
 0x311   : > { %v484_v63 = vmul.f32 %v473_v61, %v952_v5  ;;  %v485_v3 = vmul.f32 %v473_v61, %v954_v6  ;;  %v482_v7 = vmul.f32 %v469_v62, %v942_v0  ;;  %v483_v10 = vmul.f32 %v469_v62, %v944_v1 }
 0x313   : > { %492 = vst [vmem:[%s242_s29 + $0x10] sm:$0xff] %v484_v63  ;;  %493 = vst [vmem:[%s242_s29 + $0x18] sm:$0xff] %v485_v3 }
 0x314   : > { %490 = vst [vmem:[%s242_s29] sm:$0xff] %v482_v7  ;;  %491 = vst [vmem:[%s242_s29 + $0x8] sm:$0xff] %v483_v10  ;;  %v477_v11 = vpop.permute.xlu1 %476 }
 0x315   : > { %v486_v12 = vmul.f32 %v477_v11, %v946_v2  ;;  %v487_v5 = vmul.f32 %v477_v11, %v950_v4 }
 0x317   : > { %494 = vst [vmem:[%s242_s29 + $0x20] sm:$0xff] %v486_v12  ;;  %495 = vst [vmem:[%s242_s29 + $0x28] sm:$0xff] %v487_v5 }
 0x318   : > { %v481_v0 = vpop.permute.xlu1 %480 }
 0x319   : > { %v488_v1 = vmul.f32 %v481_v0, %v958_v8  ;;  %v489_v2 = vmul.f32 %v481_v0, %v960_v9 }
 0x31b   : > { %496 = vst [vmem:[%s242_s29 + $0x30] sm:$0xff] %v488_v1  ;;  %497 = vst [vmem:[%s242_s29 + $0x38] sm:$0xff] %v489_v2 }
 0x31c   : > { %734 = shalt.err (!%p731_p2)
}
 0x31d   : > { %s735_s11 = scalar_lea.hbm %s1001_s16, 1024  ;;  %s739_s26 = scalar_lea.hbm %s1052_s5, 2048 }
 0x31e   : > { %p736_p4 = scmp.ne.s32.totalorder %s1001_s16, %s735_s11  ;;  %p740_p9 = scmp.lt.u32.totalorder %s1001_s16, %s1052_s5 }
 0x31f   : > { %p741_p1 = scmp.lt.u32.totalorder %s739_s26, %s735_s11  ;;  %p743_p6 = scmp.lt.u32.totalorder %s735_s11, %s1001_s16 }
 0x320   : > { %p737_p5 = pnand %p736_p4, %p1059_p11 }
 0x321   : > { %p742_p3 = por %p741_p1, %p740_p9 }
 0x322   : > { %p738_p7 = pneg %p737_p5 }
 0x323   : > { %p744_p12 = por %p743_p6, %p742_p3 }
 0x325   : > { %p745_p13 = pnand %p744_p12, %p738_p7 }
 0x327   : > { %748 = shalt.err (!%p745_p13)
}
 0x328   : > { %s796_s14 = smov 256   ;;  %s797_s25 = smov 16  }
 0x329   : > { %636 = dma.vmem_to_hbm [thread:$0]  (%p1059_p11), %s996_s12, 1024, %s1001_s16, %s499_s22, %s796_s14, %s796_s14, %s797_s25  }
 0x32a PF: > { %s527_s15 = sand.u32 1, %s775_s18   ;;  %p1060_p8 = scmp.ne.s32.totalorder %s1057_s6, 0 }
 0x32b   : > { %p1061_p10 = scmp.ge.s32.totalorder %s787_s21, 2  ;;  %s528_s8 = scalar_lea.sflag [#allocation4], %s527_s15 }
 0x32d   : > { %p643_p0 = pnand %p1061_p10, %p1060_p8 }
 0x32f   : > { %770 = dma.done.wait (!%p643_p0), %s528_s8, 1024  }
 0x330   : > { %772 = vsyncadd (!%p643_p0), %s528_s8, 4294966272  ;;  %p18_p2 = scmp.ge.s32.totalorder %s853_s24, 4   ;;  %s1062_s18 = smov %s779_s19 }
 0x331   : > { %s1063_s19 = smov %s783_s20  ;;  %s1064_s20 = smov %s865_s27 }
 0x332   : > { %s1065_s21 = smov %s853_s24  ;;  %20 = sbr.rel (!%p18_p2) target bundleno = 5 (0x5), region = 85 }
 0x339   :  { %533 = vsyncpa [#allocation3], 1 }
 0x33a   :  { %535 = vsyncpa [#allocation3 + $0x1], 1 }
 0x33b   :  { %536 = vsyncpa [#allocation4], 1 }
 0x33c   :  { %538 = vsyncpa [#allocation4 + $0x1], 1 }

</bundles_post_ra>
